<compile_context>
chip_gen: v7x
topology: tpu7x:2x2x1
jax: 0.10.0
libtpu: 0.0.40
codegen_flags: <defaults>
</compile_context>

<pallas_src>
import functools
import math

import jax
import jax.numpy as jnp
from jax.experimental import pallas as pl
from jax.experimental.pallas import tpu as pltpu


def _round_up(x: int, m: int) -> int:
    return ((x + m - 1) // m) * m


# -----------------------------------------------------------------------------
# Fast path: whole flattened (H*W) plane(s) per block.
# -----------------------------------------------------------------------------
def _grad_flat_kernel(x_ref, mc_ref, mr_ref, o_ref, *, w, hw, hw_pad, l1, cdt):
    """x_ref/o_ref: (tn, hw) blocks; each row is one flattened (H, W) plane.

    mc_ref / mr_ref: (1, hw_pad) resident {0,1} masks (column-0 / row-0 zeros).
    """
    x = x_ref[...].astype(cdt)                                   # (tn, hw)
    if hw_pad != hw:
        # In-kernel zero pad to a 128-aligned lane width (VMEM-only work; no
        # wrapper HBM pad/crop round trip).
        x = jnp.concatenate(
            [x, jnp.zeros((x.shape[0], hw_pad - hw), cdt)], axis=1)
    # prev_col[k] = x[k-1]; roll wrap lands on plane-column-0 lanes (masked).
    left = pltpu.roll(x, shift=1, axis=1)
    # prev_row[k] = x[k-W]; roll wrap lands on the first image row (masked).
    up = pltpu.roll(x, shift=w, axis=1)
    dx = left * mc_ref[...] - x
    dy = up * mr_ref[...] - x
    if l1:
        res = jnp.abs(dx) + jnp.abs(dy)
    else:
        dxf = dx.astype(jnp.float32)
        dyf = dy.astype(jnp.float32)
        res = jnp.sqrt(dxf * dxf + dyf * dyf)
    if hw_pad != hw:
        res = res[:, :hw]
    # NOTE: rows of a partial final block may compute garbage (even NaN via
    # sqrt) but their stores are masked out by Pallas -- harmless.
    o_ref[...] = res.astype(o_ref.dtype)


# -----------------------------------------------------------------------------
# Large-plane path: flattened axis split into 128-aligned chunks + halo read.
# -----------------------------------------------------------------------------
def _grad_chunk_kernel(x_ref, halo_ref, mc_ref, mr_ref, o_ref, *, w, hh, l1, cdt):
    """x_ref: (tn, C) chunk; halo_ref: (tn, hh) lanes just before the chunk."""
    x = x_ref[...].astype(cdt)
    halo = halo_ref[...].astype(cdt)
    cat = jnp.concatenate([halo, x], axis=1)          # (tn, hh + C), aligned
    # left[k] = cat[hh + k - 1]; up[k] = cat[hh + k - w]; both pull from the
    # halo for the first lanes of the chunk. Slices start at hh (128-aligned).
    left = pltpu.roll(cat, shift=1, axis=1)[:, hh:]
    up = pltpu.roll(cat, shift=w, axis=1)[:, hh:]
    dx = left * mc_ref[...] - x
    dy = up * mr_ref[...] - x
    if l1:
        res = jnp.abs(dx) + jnp.abs(dy)
    else:
        dxf = dx.astype(jnp.float32)
        dyf = dy.astype(jnp.float32)
        res = jnp.sqrt(dxf * dxf + dyf * dyf)
    o_ref[...] = res.astype(o_ref.dtype)


def tensor_gradient(img: jax.Array, L1: bool = True, *,
                    block_bytes: int = 2 * 1024 * 1024) -> jax.Array:
    """Pallas implementation of TensorGradient.forward for (..., H, W) input."""
    orig_shape = img.shape
    H, W = orig_shape[-2], orig_shape[-1]
    N = math.prod(orig_shape[:-2])
    L = H * W
    itemsize = jnp.dtype(img.dtype).itemsize

    # bf16 math on bf16 inputs (v6e/v7x bf16 VPU); everything else in f32.
    if img.dtype in (jnp.dtype(jnp.bfloat16), jnp.dtype(jnp.float32)):
        cdt = img.dtype
    else:
        cdt = jnp.float32

    x = img.reshape(N, L)
    lp = _round_up(L, 128)

    cost = pl.CostEstimate(
        flops=7 * N * L,
        transcendentals=0 if L1 else N * L,
        bytes_accessed=2 * N * L * itemsize,
    )

    use_chunked = min(8, N) * lp * itemsize > block_bytes

    if not use_chunked:
        # ---------------- fast path: whole plane(s) per block ----------------
        if N <= 8:
            tn = N
        else:
            # ~block_bytes of input per step (amortizes ~0.35us/step), capped
            # so there are always >= 2 grid steps (both v7x TensorCores busy).
            rows_budget = max(8, ((block_bytes // (lp * itemsize)) // 8) * 8)
            rows_half = _round_up(-(-N // 2), 8)
            tn = min(rows_budget, rows_half)
        grid = (pl.cdiv(N, tn),)

        idx = jnp.arange(lp, dtype=jnp.int32)
        mask_col = (idx % W != 0).astype(cdt).reshape(1, lp)   # 0 at column 0
        mask_row = (idx >= W).astype(cdt).reshape(1, lp)       # 0 at row 0

        # Scoped-VMEM request from actual need (double-buffered in/out blocks
        # plus in-kernel temporaries), clamped well below v7x's 64 MiB.
        need = 4 * tn * lp * itemsize + 8 * tn * lp * 4
        vmem_limit = int(min(48 * 1024 * 1024, max(32 * 1024 * 1024, need)))

        kernel = functools.partial(
            _grad_flat_kernel, w=W, hw=L, hw_pad=lp, l1=L1, cdt=cdt)
        out = pl.pallas_call(
            kernel,
            out_shape=jax.ShapeDtypeStruct((N, L), img.dtype),
            grid=grid,
            in_specs=[
                pl.BlockSpec((tn, L), lambda i: (i, 0)),
                pl.BlockSpec((1, lp), lambda i: (0, 0)),   # resident mask
                pl.BlockSpec((1, lp), lambda i: (0, 0)),   # resident mask
            ],
            out_specs=pl.BlockSpec((tn, L), lambda i: (i, 0)),
            compiler_params=pltpu.CompilerParams(
                dimension_semantics=("parallel",),
                vmem_limit_bytes=vmem_limit,
            ),
            cost_estimate=cost,
        )(x, mask_col, mask_row)
        return out.reshape(orig_shape)

    # ---------------- chunked path: split the flattened plane ----------------
    tn = N if N <= 8 else 8
    hh = _round_up(W, 128)                                   # halo width
    c = max(hh, ((block_bytes // max(1, tn * itemsize)) // hh) * hh)
    lpad = _round_up(L, c)
    n_chunks = lpad // c
    cpb = c // hh                                            # chunk in halo units

    # TODO(synk): wrapper pad/crop here costs one extra HBM round trip; kept
    # only on this large-plane fallback where L itself must be split.
    xp = jnp.pad(x, ((0, 0), (0, lpad - L))) if lpad != L else x

    idx = jnp.arange(lpad, dtype=jnp.int32)
    mask_col = (idx % W != 0).astype(cdt).reshape(1, lpad)
    mask_row = (idx >= W).astype(cdt).reshape(1, lpad)

    need = 4 * tn * (c + hh) * itemsize + 8 * tn * c * 4
    vmem_limit = int(min(48 * 1024 * 1024, max(32 * 1024 * 1024, need)))

    kernel = functools.partial(_grad_chunk_kernel, w=W, hh=hh, l1=L1, cdt=cdt)
    out = pl.pallas_call(
        kernel,
        out_shape=jax.ShapeDtypeStruct((N, lpad), img.dtype),
        grid=(pl.cdiv(N, tn), n_chunks),
        in_specs=[
            pl.BlockSpec((tn, c), lambda i, j: (i, j)),
            # Halo: the hh lanes right before this chunk (clamped for j == 0,
            # where those lanes are masked anyway).
            pl.BlockSpec((tn, hh),
                         lambda i, j: (i, jnp.maximum(j * cpb - 1, 0))),
            pl.BlockSpec((1, c), lambda i, j: (0, j)),
            pl.BlockSpec((1, c), lambda i, j: (0, j)),
        ],
        out_specs=pl.BlockSpec((tn, c), lambda i, j: (i, j)),
        compiler_params=pltpu.CompilerParams(
            dimension_semantics=("parallel", "arbitrary"),
            vmem_limit_bytes=vmem_limit,
        ),
        cost_estimate=cost,
    )(xp, xp, mask_col, mask_row)
    if lpad != L:
        out = out[:, :L]
    return out.reshape(orig_shape)


def _tensor_gradient_ref(img: jax.Array, L1: bool = True) -> jax.Array:
    """Pure-JAX reference (mirrors the PyTorch code exactly)."""
    prev_col = jnp.pad(img[..., :, :-1], [(0, 0)] * (img.ndim - 1) + [(1, 0)])
    prev_row = jnp.pad(img[..., :-1, :],
                       [(0, 0)] * (img.ndim - 2) + [(1, 0), (0, 0)])
    dx = prev_col - img
    dy = prev_row - img
    if L1:
        return jnp.abs(dx) + jnp.abs(dy)
    return jnp.sqrt(dx * dx + dy * dy)


if __name__ == "__main__":
    key = jax.random.PRNGKey(0)
    k1, k2, k3 = jax.random.split(key, 3)

    # Main demo: (2, 4, 16, 16) f32, L1 and L2 (single-block fast path).
    x = jax.random.normal(k1, (2, 4, 16, 16), dtype=jnp.float32)
    out = jax.block_until_ready(tensor_gradient(x, L1=True))
    ref = _tensor_gradient_ref(x, L1=True)
    assert out.shape == x.shape and out.dtype == x.dtype
    assert jnp.allclose(out, ref, atol=1e-5, rtol=1e-5), "L1 mismatch"

    out_l2 = jax.block_until_ready(tensor_gradient(x, L1=False))
    ref_l2 = _tensor_gradient_ref(x, L1=False)
    assert jnp.allclose(out_l2, ref_l2, atol=1e-5, rtol=1e-5), "L2 mismatch"

    # Multi-grid-step fast path (resident masks, "parallel" row axis -> >= 2
    # steps for v7x megacore).
    xb = jax.random.normal(k2, (4, 8, 16, 16), dtype=jnp.float32)
    outb = jax.block_until_ready(tensor_gradient(xb, L1=True))
    assert jnp.allclose(outb, _tensor_gradient_ref(xb, L1=True),
                        atol=1e-5, rtol=1e-5), "multi-block mismatch"

    # bf16 path (bf16 math on the VPU for v6e/v7x).
    xh = x.astype(jnp.bfloat16)
    outh = jax.block_until_ready(tensor_gradient(xh, L1=True))
    refh = _tensor_gradient_ref(xh, L1=True)
    assert outh.dtype == jnp.bfloat16
    assert jnp.allclose(outh.astype(jnp.float32), refh.astype(jnp.float32),
                        atol=5e-2, rtol=5e-2), "bf16 mismatch"

    # Large-plane chunked path, forced small so the demo stays tiny
    # (non-128-multiple H*W, non-power-of-two W, L2).
    xc = jax.random.normal(k3, (1, 1, 40, 50), dtype=jnp.float32)
    outc = jax.block_until_ready(tensor_gradient(xc, L1=False, block_bytes=4096))
    assert jnp.allclose(outc, _tensor_gradient_ref(xc, L1=False),
                        atol=1e-5, rtol=1e-5), "chunked-path mismatch"

    print("KERNEL_OK")
</pallas_src>

<mosaic_0001>
module attributes {stable_mosaic.version = 11 : i64} {
  func.func @_grad_flat_kernel(%arg0: i32, %arg1: memref<8x256xf32, #tpu.memory_space<vmem>>, %arg2: memref<1x256xf32, #tpu.memory_space<vmem>>, %arg3: memref<1x256xf32, #tpu.memory_space<vmem>>, %arg4: memref<8x256xf32, #tpu.memory_space<vmem>>) attributes {dimension_semantics = [#tpu.dimension_semantics<parallel>], iteration_bounds = array<i64: 1>, scalar_prefetch = 0 : i64, scratch_operands = 0 : i64, tpu.core_type = #tpu.core_type<tc>, window_params = [{transform_indices = @transform_0, window_bounds = array<i64: 8, 256>}, {pipeline_mode = #tpu.pipeline_mode<synchronous>, transform_indices = @transform_1, window_bounds = array<i64: 1, 256>}, {pipeline_mode = #tpu.pipeline_mode<synchronous>, transform_indices = @transform_2, window_bounds = array<i64: 1, 256>}, {transform_indices = @transform_3, window_bounds = array<i64: 8, 256>}]} {
    %c0 = arith.constant 0 : index
    %c0_0 = arith.constant 0 : index
    %0 = vector.load %arg1[%c0, %c0_0] : memref<8x256xf32, #tpu.memory_space<vmem>>, vector<8x256xf32>
    %c1_i32 = arith.constant 1 : i32
    %1 = tpu.dynamic_rotate %0 by %c1_i32 dim 1 : vector<8x256xf32>, i32 -> vector<8x256xf32>
    %c16_i32 = arith.constant 16 : i32
    %2 = tpu.dynamic_rotate %0 by %c16_i32 dim 1 : vector<8x256xf32>, i32 -> vector<8x256xf32>
    %c0_1 = arith.constant 0 : index
    %c0_2 = arith.constant 0 : index
    %3 = vector.load %arg2[%c0_1, %c0_2] : memref<1x256xf32, #tpu.memory_space<vmem>>, vector<1x256xf32>
    %4 = vector.broadcast %3 : vector<1x256xf32> to vector<8x256xf32>
    %5 = arith.mulf %1, %4 : vector<8x256xf32>
    %6 = arith.subf %5, %0 : vector<8x256xf32>
    %c0_3 = arith.constant 0 : index
    %c0_4 = arith.constant 0 : index
    %7 = vector.load %arg3[%c0_3, %c0_4] : memref<1x256xf32, #tpu.memory_space<vmem>>, vector<1x256xf32>
    %8 = vector.broadcast %7 : vector<1x256xf32> to vector<8x256xf32>
    %9 = arith.mulf %2, %8 : vector<8x256xf32>
    %10 = arith.subf %9, %0 : vector<8x256xf32>
    %11 = math.absf %6 : vector<8x256xf32>
    %12 = math.absf %10 : vector<8x256xf32>
    %13 = arith.addf %11, %12 : vector<8x256xf32>
    %c0_5 = arith.constant 0 : index
    %c0_6 = arith.constant 0 : index
    %14 = vector.load %arg4[%c0_5, %c0_6] : memref<8x256xf32, #tpu.memory_space<vmem>>, vector<8x256xf32>
    tpu.vector_store %arg4[%c0_5, %c0_6], %13 {strides = array<i32>} : memref<8x256xf32, #tpu.memory_space<vmem>>, vector<8x256xf32>,
    return
  }
  func.func @transform_0(%arg0: i32) -> (i32, i32) {
    %c0_i32 = arith.constant 0 : i32
    %c0_i32_0 = arith.constant 0 : i32
    return %arg0, %c0_i32 : i32, i32
  }
  func.func @transform_1(%arg0: i32) -> (i32, i32) {
    %c0_i32 = arith.constant 0 : i32
    %c0_i32_0 = arith.constant 0 : i32
    %c0_i32_1 = arith.constant 0 : i32
    return %c0_i32, %c0_i32_0 : i32, i32
  }
  func.func @transform_2(%arg0: i32) -> (i32, i32) {
    %c0_i32 = arith.constant 0 : i32
    %c0_i32_0 = arith.constant 0 : i32
    %c0_i32_1 = arith.constant 0 : i32
    return %c0_i32, %c0_i32_0 : i32, i32
  }
  func.func @transform_3(%arg0: i32) -> (i32, i32) {
    %c0_i32 = arith.constant 0 : i32
    %c0_i32_0 = arith.constant 0 : i32
    return %arg0, %c0_i32 : i32, i32
  }
}

</mosaic_0001>

<bundles_post_ra>
// kernel: tpu_custom_call.1
= control target key start
LH: loop header
LB: loop body
LE: loop exit
PB: predicated region body
PF: predicated region fallthrough
CT: control target
= control target key end

     0   :  { %8 = vsyncpa [#allocation3], 0  ;;  %s206_s0 = inlined_call_operand.hbm [shape: f32[8,256], index: 0, kind: input, shape index: {}]   ;;  %s207_s1 = inlined_call_operand.vmem [shape: f32[1,256], index: 1, kind: input, shape index: {}]   ;;  %s208_s2 = inlined_call_operand.vmem [shape: f32[1,256], index: 2, kind: input, shape index: {}]   ;;  %s209_s3 = inlined_call_operand.hbm [shape: f32[8,256], index: 3, kind: output, shape index: {}]  }
   0x1   :  { %9 = vsyncpa [#allocation4], 0  ;;  %s152_s12 = smov [#allocation2]   ;;  %s104_s16 = scalar_lea.hbm %s206_s0, 256 }
   0x2   :  { %s16_s13 = sshll.u32 %s152_s12, 4  ;;  %p105_p0 = scmp.ne.s32.totalorder %s206_s0, %s104_s16  ;;  %s17_s13 = int_to_ptr.vmem [resolvable:$true] %s16_s13 }
   0x3   :  { %p108_p1 = scmp.lt.u32.totalorder %s104_s16, %s206_s0 }
   0x5   :  { %p110_p2 = pnand %p108_p1, %p105_p0 }
   0x7   :  { %113 = shalt.err (!%p110_p2)
}
   0x8   :  { %s114_s21 = scalar_lea.vmem %s17_s13, 256  ;;  %p119_p4 = scmp.lt.s32.totalorder %s17_s13, %s17_s13 }
   0x9   :  { %p115_p3 = scmp.ne.s32.totalorder %s17_s13, %s114_s21  ;;  %p120_p5 = scmp.lt.s32.totalorder %s114_s21, %s114_s21 }
   0xb   :  { %p121_p6 = por %p120_p5, %p119_p4 }
   0xd   :  { %p122_p7 = pnand %p121_p6, %p115_p3 }
   0xf   :  { %125 = shalt.err (!%p122_p7)
}
  0x10   :  { %19 = dma.hbm_to_vmem [thread:$0]  %s206_s0, 256, %s17_s13, [#allocation3]  }
  0x11   :  { %148 = dma.done.wait [#allocation3], 256  }
  0x12   :  { %149 = vsyncadd [#allocation3], 4294967040  ;;  %v27_v0 = vld [vmem:[#allocation2] sm:$0xff]  ;;  %s153_s24 = smov 16   ;;  %s154_s25 = smov 1   ;;  %v28_v1 = vld [vmem:[#allocation2 + $0x8] sm:$0xff]  ;;  %v33_v2 = vlaneseq }
  0x13   :  { %38 = vrot.lane.b32.xlu1 %v27_v0, %s153_s24  ;;  %29 = vrot.lane.b32.xlu0 %v27_v0, %s154_s25  ;;  %v61_v7 = vld [vmem:[%s208_s2] sm:$0x3] }
  0x14   :  { %v48_v3 = vshrl.u32 %v33_v2, 7  ;;  %v34_v4 = vand.u32 127, %v33_v2  ;;  %v45_v8 = vld [vmem:[%s207_s1] sm:$0x3]  ;;  %s155_s1 = smov [#allocation5]  }
  0x15   :  { %s91_s2 = sshll.u32 %s155_s1, 4  ;;  %s92_s2 = int_to_ptr.vmem [resolvable:$true] %s91_s2 }
  0x16   :  { %v49_v5 = vsub.s32 0, %v48_v3  ;;  %v53_v6 = vsub.s32 1, %v48_v3  ;;  %vm42_vm0 = vcmp.lt.s32.totalorder %v34_v4, 16  ;;  %vm35_vm1 = vcmp.lt.s32.totalorder %v34_v4, 1  ;;  %s126_s29 = scalar_lea.vmem %s92_s2, 256  ;;  %p131_p9 = scmp.lt.s32.totalorder %s92_s2, %s92_s2 }
  0x17   :  { %40 = vrot.lane.b32.xlu1 %v28_v1, %s153_s24  ;;  %31 = vrot.lane.b32.xlu0 %v28_v1, %s154_s25  ;;  %p127_p8 = scmp.ne.s32.totalorder %s92_s2, %s126_s29  ;;  %p132_p10 = scmp.lt.s32.totalorder %s126_s29, %s126_s29 }
  0x18   :  { %v66_v11 = vrot.slane %v61_v7, %v49_v5  ;;  %v70_v12 = vrot.slane %v61_v7, %v53_v6  ;;  %v50_v13 = vrot.slane %v45_v8, %v49_v5  ;;  %v54_v14 = vrot.slane %v45_v8, %v53_v6 }
  0x19   :  { %p133_p11 = por %p132_p10, %p131_p9 }
  0x1b   :  { %p134_p12 = pnand %p133_p11, %p127_p8 }
  0x85   :  { %v39_v9 = vpop.permute.xlu1 %38  ;;  %v30_v10 = vpop.permute.xlu0 %29 }
  0x89   :  { %v41_v15 = vpop.permute.xlu1 %40  ;;  %v32_v16 = vpop.permute.xlu0 %31 }
  0x8a   :  { %v43_v17 = vsel %vm42_vm0, %v39_v9, %v41_v15  ;;  %v44_v18 = vsel %vm42_vm0, %v41_v15, %v39_v9  ;;  %v36_v19 = vsel %vm35_vm1, %v30_v10, %v32_v16  ;;  %v37_v20 = vsel %vm35_vm1, %v32_v16, %v30_v10 }
  0x8b   :  { %v73_v21 = vmul.f32 %v66_v11, %v44_v18  ;;  %v74_v22 = vmul.f32 %v70_v12, %v43_v17  ;;  %v57_v23 = vmul.f32 %v50_v13, %v37_v20  ;;  %v58_v24 = vmul.f32 %v54_v14, %v36_v19 }
  0x8d   :  { %v75_v25 = vsub.f32 %v73_v21, %v27_v0  ;;  %v76_v26 = vsub.f32 %v74_v22, %v28_v1  ;;  %v59_v27 = vsub.f32 %v57_v23, %v27_v0  ;;  %v60_v28 = vsub.f32 %v58_v24, %v28_v1 }
  0x8f   :  { %v79_v29 = vand.u32 2147483647, %v75_v25  ;;  %v80_v30 = vand.u32 2147483647, %v76_v26  ;;  %v77_v31 = vand.u32 2147483647, %v59_v27 }
  0x90   :  { %v78_v32 = vand.u32 2147483647, %v60_v28 }
  0x91   :  { %v81_v33 = vadd.f32 %v79_v29, %v77_v31 }
  0x92   :  { %v82_v34 = vadd.f32 %v80_v30, %v78_v32 }
  0x93   :  { %83 = vst [vmem:[#allocation5] sm:$0xff] %v81_v33 }
  0x94   :  { %84 = vst [vmem:[#allocation5 + $0x8] sm:$0xff] %v82_v34 }
  0x95   :  { %137 = shalt.err (!%p134_p12)
}
  0x96   :  { %s138_s5 = scalar_lea.hbm %s209_s3, 256 }
  0x97   :  { %p139_p13 = scmp.ne.s32.totalorder %s209_s3, %s138_s5  ;;  %p142_p0 = scmp.lt.u32.totalorder %s138_s5, %s209_s3 }
  0x99   :  { %p144_p1 = pnand %p142_p0, %p139_p13 }
  0x9b   :  { %147 = shalt.err (!%p144_p1)
}
  0x9c   :  { %94 = dma.vmem_to_hbm [thread:$0]  %s92_s2, 256, %s209_s3, [#allocation4]  }
  0x9d   :  { %150 = dma.done.wait [#allocation4], 256  }
  0x9e   :  { %151 = vsyncadd [#allocation4], 4294967040 }
  0x9f   :  { %98 = vsyncpa [#allocation3], 1 }
  0xa0   :  { %99 = vsyncpa [#allocation4], 1 }

</bundles_post_ra>
